<compile_context>
chip_gen: v7x
topology: tpu7x:2x2x1
jax: 0.10.0
libtpu: 0.0.40
codegen_flags: <defaults>
</compile_context>

<pallas_src>
import jax
import jax.numpy as jnp
from jax.experimental import pallas as pl
from jax.experimental.pallas import tpu as pltpu


def _cdiv(a, b):
    return -(-a // b)


def _round_up(n, m):
    return _cdiv(n, m) * m


_VMEM_CAP_CACHE = []


def _vmem_capacity_bytes():
    """Per-core VMEM capacity; conservative 64 MiB (v7x) fallback."""
    if not _VMEM_CAP_CACHE:
        try:
            cap = int(pltpu.get_tpu_info().vmem_capacity_bytes)
        except Exception:
            cap = 64 * 1024 * 1024
        _VMEM_CAP_CACHE.append(cap)
    return _VMEM_CAP_CACHE[0]


def _auto_tk(C, HW, itemsize, n_par, cap):
    """Pick the K-tile: big enough for HBM efficiency, small enough for VMEM,
    and small enough that each core gets >= 2 pipeline steps."""
    usable = max(cap - (16 << 20), 24 << 20)          # leave Mosaic headroom
    in_budget = max(usable - 4 * C * C * 4, 4 << 20)  # minus output buffers
    tk_vmem = in_budget // (4 * C * itemsize)         # 2 inputs x 2 buffers
    tk_hbm = (8 << 20) // max(2 * C * itemsize, 1)    # >= ~8 MiB HBM per step
    tk = min(tk_vmem, max(tk_hbm, 1024))
    hw_per_core = _cdiv(HW, max(n_par, 1))
    tk = min(tk, _round_up(_cdiv(hw_per_core, 2), 128))  # >= 2 steps / core
    return max(128, (tk // 128) * 128)


def _make_style_gram_kernel(C, tk, hw, n_k_per, needs_mask):
    """Accumulates A = sum_k (x_k + y_k) @ (x_k - y_k)^T into the (1,C,C)
    output block resident across the K axis."""
    dn = (((1,), (1,)), ((), ()))  # contract last dims: (C,tk) x (C,tk) -> (C,C)

    def kernel(x_ref, y_ref, o_ref):
        k = pl.program_id(1)

        @pl.when(k == 0)
        def _init():
            o_ref[...] = jnp.zeros_like(o_ref)

        xk = x_ref[...]  # native dtype; MXU accumulates in f32
        yk = y_ref[...]
        s = xk + yk
        d = xk - yk
        if needs_mask:
            # Zero out logical columns >= HW (ragged tail / overhang tiles).
            p = pl.program_id(0)
            tile = p * n_k_per + k
            col = tile * tk + jax.lax.broadcasted_iota(jnp.int32, (C, tk), 1)
            valid = col < hw
            zero = jnp.zeros((), s.dtype)
            s = jnp.where(valid, s, zero)
            d = jnp.where(valid, d, zero)

        a = jax.lax.dot_general(
            s, d, dimension_numbers=dn, preferred_element_type=jnp.float32
        )
        o_ref[...] += a[None, :, :]

    return kernel


def style_loss(x, y, *, tk=None, n_par=2, compute_dtype=None):
    """x, y: (R, C, H, W) with R == 1. Returns scalar f32 style loss."""
    assert x.shape == y.shape, "x and y must have the same shape"
    R, C, H, W = x.shape
    assert R == 1, "reference view(C, H*W) requires batch == 1"
    HW = H * W

    x2 = x.reshape(C, HW)
    y2 = y.reshape(C, HW)
    if compute_dtype is not None:
        # e.g. jnp.bfloat16 on v5e / large-C v6e: halves HBM traffic, native MXU.
        x2 = x2.astype(compute_dtype)
        y2 = y2.astype(compute_dtype)
    itemsize = jnp.dtype(x2.dtype).itemsize

    cap = _vmem_capacity_bytes()
    if tk is None:
        tk = _auto_tk(C, HW, itemsize, n_par, cap)
    tk = max(128, _round_up(tk, 128))
    tk = min(tk, _round_up(HW, 128))

    n_k_total = _cdiv(HW, tk)
    n_par = max(1, min(n_par, n_k_total))
    n_k_per = _cdiv(n_k_total, n_par)
    needs_mask = (n_par * n_k_per * tk != HW)
    max_blk = n_k_total - 1

    # Scale uses the true (unpadded) H*W, matching the reference.
    scale = 2000.0 / float(C * HW)

    # VMEM: 2 inputs x 2 pipeline buffers + double-buffered (1,C,C) output.
    est = 4 * C * tk * itemsize + 2 * C * C * 4
    headroom = 12 << 20
    vmem_limit = int(
        min(max(est + (8 << 20), 32 << 20), max(cap - headroom, est + (4 << 20)))
    )

    def in_map(p, k):
        # Clamp overhanging tiles to the last real block; their logical columns
        # are >= HW so the in-kernel mask zeroes their contribution.
        return (0, jnp.minimum(p * n_k_per + k, max_blk))

    partials = pl.pallas_call(
        _make_style_gram_kernel(C, tk, HW, n_k_per, needs_mask),
        out_shape=jax.ShapeDtypeStruct((n_par, C, C), jnp.float32),
        grid_spec=pltpu.PrefetchScalarGridSpec(
            num_scalar_prefetch=0,
            grid=(n_par, n_k_per),
            in_specs=[
                pl.BlockSpec((C, tk), in_map),
                pl.BlockSpec((C, tk), in_map),
            ],
            out_specs=pl.BlockSpec((1, C, C), lambda p, k: (p, 0, 0)),
        ),
        compiler_params=pltpu.CompilerParams(
            dimension_semantics=("parallel", "arbitrary"),
            vmem_limit_bytes=vmem_limit,
        ),
    )(x2, y2)

    # Epilogue (tiny, plain JAX): combine per-core partials, symmetrize, square.
    #   A = sum_k (x_k+y_k)(x_k-y_k)^T  =>  x x^T - y y^T = 0.5 * (A + A^T)
    #   loss = mean((scale * gram_diff)^2) = sum(D^2) * scale^2 / C^2
    A = jnp.sum(partials, axis=0)
    D = 0.5 * (A + A.T)
    return jnp.sum(D * D) * (scale * scale) / float(C * C)


def style_loss_ref(x, y):
    R, C, H, W = x.shape
    x2 = x.reshape(C, H * W).astype(jnp.float32)
    y2 = y.reshape(C, H * W).astype(jnp.float32)
    gx = (x2 @ x2.T) / (C * H * W) * 1000 * 2
    gy = (y2 @ y2.T) / (C * H * W) * 1000 * 2
    return jnp.mean((gx - gy) ** 2)


if __name__ == "__main__":
    key = jax.random.PRNGKey(0)

    # 1) Small lane-aligned case (HW = 256, exactly covered by 2 x 128 tiles).
    kx, ky = jax.random.split(key)
    shape = (1, 8, 16, 16)
    x = jax.random.normal(kx, shape, dtype=jnp.float32)
    y = jax.random.normal(ky, shape, dtype=jnp.float32)
    loss = style_loss(x, y)
    jax.block_until_ready(loss)
    ref = style_loss_ref(x, y)
    assert jnp.allclose(loss, ref, rtol=2e-4, atol=1e-3), (loss, ref)

    # 2) Ragged HW (252) — exercises the in-kernel mask / partial-tile path.
    kx2, ky2 = jax.random.split(jax.random.PRNGKey(1))
    shape2 = (1, 16, 18, 14)
    x2 = jax.random.normal(kx2, shape2, dtype=jnp.float32)
    y2 = jax.random.normal(ky2, shape2, dtype=jnp.float32)
    loss2 = style_loss(x2, y2)
    jax.block_until_ready(loss2)
    ref2 = style_loss_ref(x2, y2)
    assert jnp.allclose(loss2, ref2, rtol=2e-4, atol=1e-3), (loss2, ref2)

    # 3) Multi-step accumulation per core (HW = 512, tk forced to 128 -> 2 k-steps
    #    per parallel half), plus the single-core (n_par=1) path.
    kx3, ky3 = jax.random.split(jax.random.PRNGKey(2))
    shape3 = (1, 16, 16, 32)
    x3 = jax.random.normal(kx3, shape3, dtype=jnp.float32)
    y3 = jax.random.normal(ky3, shape3, dtype=jnp.float32)
    ref3 = style_loss_ref(x3, y3)
    loss3 = style_loss(x3, y3, tk=128)
    jax.block_until_ready(loss3)
    assert jnp.allclose(loss3, ref3, rtol=2e-4, atol=1e-3), (loss3, ref3)
    loss3b = style_loss(x3, y3, tk=128, n_par=1)
    jax.block_until_ready(loss3b)
    assert jnp.allclose(loss3b, ref3, rtol=2e-4, atol=1e-3), (loss3b, ref3)

    print("KERNEL_OK")
</pallas_src>

<mosaic_0001>
module attributes {stable_mosaic.version = 11 : i64} {
  func.func @kernel(%arg0: i32, %arg1: i32, %arg2: memref<8x128xf32, #tpu.memory_space<vmem>>, %arg3: memref<8x128xf32, #tpu.memory_space<vmem>>, %arg4: memref<1x8x8xf32, #tpu.memory_space<vmem>>) attributes {dimension_semantics = [#tpu.dimension_semantics<parallel>, #tpu.dimension_semantics<arbitrary>], iteration_bounds = array<i64: 2, 1>, scalar_prefetch = 0 : i64, scratch_operands = 0 : i64, tpu.core_type = #tpu.core_type<tc>, window_params = [{transform_indices = @transform_0, window_bounds = array<i64: 8, 128>}, {transform_indices = @transform_1, window_bounds = array<i64: 8, 128>}, {transform_indices = @transform_2, window_bounds = array<i64: 1, 8, 8>}]} {
    %c0_i32 = arith.constant 0 : i32
    %0 = arith.cmpi eq, %arg1, %c0_i32 : i32
    %1 = arith.extui %0 : i1 to i32
    %c0_i32_0 = arith.constant 0 : i32
    %2 = arith.cmpi ne, %1, %c0_i32_0 : i32
    scf.if %2 {
      %cst_10 = arith.constant 0.000000e+00 : f32
      %12 = vector.broadcast %cst_10 : f32 to vector<1x8x8xf32>
      %c0_11 = arith.constant 0 : index
      %c0_12 = arith.constant 0 : index
      %c0_13 = arith.constant 0 : index
      %13 = vector.load %arg4[%c0_11, %c0_12, %c0_13] : memref<1x8x8xf32, #tpu.memory_space<vmem>>, vector<1x8x8xf32>
      tpu.vector_store %arg4[%c0_11, %c0_12, %c0_13], %12 {strides = array<i32>} : memref<1x8x8xf32, #tpu.memory_space<vmem>>, vector<1x8x8xf32>,
    } else {
    }
    %c0 = arith.constant 0 : index
    %c0_1 = arith.constant 0 : index
    %3 = vector.load %arg2[%c0, %c0_1] : memref<8x128xf32, #tpu.memory_space<vmem>>, vector<8x128xf32>
    %c0_2 = arith.constant 0 : index
    %c0_3 = arith.constant 0 : index
    %4 = vector.load %arg3[%c0_2, %c0_3] : memref<8x128xf32, #tpu.memory_space<vmem>>, vector<8x128xf32>
    %5 = arith.addf %3, %4 : vector<8x128xf32>
    %6 = arith.subf %3, %4 : vector<8x128xf32>
    %cst = arith.constant dense<0.000000e+00> : vector<8x8xf32>
    %7 = tpu.matmul %5, %6, %cst {dimension_numbers = #tpu.dot_dimension_numbers<[1], [1], [0], [0], [0, 0, 1, 0], [], []>} : vector<8x128xf32>, vector<8x128xf32>, vector<8x8xf32> -> vector<8x8xf32>
    %c0_4 = arith.constant 0 : index
    %c0_5 = arith.constant 0 : index
    %c0_6 = arith.constant 0 : index
    %8 = vector.load %arg4[%c0_4, %c0_5, %c0_6] : memref<1x8x8xf32, #tpu.memory_space<vmem>>, vector<1x8x8xf32>
    %9 = vector.shape_cast %7 : vector<8x8xf32> to vector<1x8x8xf32>
    %10 = arith.addf %8, %9 : vector<1x8x8xf32>
    %c0_7 = arith.constant 0 : index
    %c0_8 = arith.constant 0 : index
    %c0_9 = arith.constant 0 : index
    %11 = vector.load %arg4[%c0_7, %c0_8, %c0_9] : memref<1x8x8xf32, #tpu.memory_space<vmem>>, vector<1x8x8xf32>
    tpu.vector_store %arg4[%c0_7, %c0_8, %c0_9], %10 {strides = array<i32>} : memref<1x8x8xf32, #tpu.memory_space<vmem>>, vector<1x8x8xf32>,
    return
  }
  func.func @transform_0(%arg0: i32, %arg1: i32) -> (i32, i32) {
    %c1_i32 = arith.constant 1 : i32
    %0 = arith.muli %arg0, %c1_i32 : i32
    %1 = arith.addi %0, %arg1 : i32
    %c1_i32_0 = arith.constant 1 : i32
    %2 = arith.minsi %1, %c1_i32_0 : i32
    %c0_i32 = arith.constant 0 : i32
    %c0_i32_1 = arith.constant 0 : i32
    return %c0_i32, %2 : i32, i32
  }
  func.func @transform_1(%arg0: i32, %arg1: i32) -> (i32, i32) {
    %c1_i32 = arith.constant 1 : i32
    %0 = arith.muli %arg0, %c1_i32 : i32
    %1 = arith.addi %0, %arg1 : i32
    %c1_i32_0 = arith.constant 1 : i32
    %2 = arith.minsi %1, %c1_i32_0 : i32
    %c0_i32 = arith.constant 0 : i32
    %c0_i32_1 = arith.constant 0 : i32
    return %c0_i32, %2 : i32, i32
  }
  func.func @transform_2(%arg0: i32, %arg1: i32) -> (i32, i32, i32) {
    %c0_i32 = arith.constant 0 : i32
    %c0_i32_0 = arith.constant 0 : i32
    %c0_i32_1 = arith.constant 0 : i32
    return %arg0, %c0_i32, %c0_i32_0 : i32, i32, i32
  }
}

</mosaic_0001>

<bundles_post_ra>
// kernel: tpu_custom_call.1
= control target key start
LH: loop header
LB: loop body
LE: loop exit
PB: predicated region body
PF: predicated region fallthrough
CT: control target
= control target key end

     0   :  { %7 = vsyncpa [#allocation3], 0  ;;  %s992_s0 = inlined_call_operand.hbm [shape: f32[8,256], index: 0, kind: input, shape index: {}]   ;;  %s993_s1 = inlined_call_operand.hbm [shape: f32[8,256], index: 1, kind: input, shape index: {}]   ;;  %s994_s2 = inlined_call_operand.hbm [shape: f32[2,8,8], index: 2, kind: output, shape index: {}]  }
   0x1   :  { %9 = vsyncpa [#allocation3 + $0x1], 0 }
   0x2   :  { %10 = vsyncpa [#allocation6], 0 }
   0x3   :  { %12 = vsyncpa [#allocation6 + $0x1], 0 }
   0x4   :  { %13 = vsyncpa [#allocation4], 0 }
   0x5   :  { %15 = vsyncpa [#allocation4 + $0x1], 0  ;;  %s739_s9 = smov 0   ;;  %s741_s10 = smov 0  }
   0x6   :  { %s743_s11 = smov 0   ;;  %s745_s12 = smov 0  }
   0x7   :  { %s747_s13 = smov 0   ;;  %s749_s14 = smov 0  }
   0x8   :  { %s751_s15 = smov 0   ;;  %s753_s16 = smov 0  }
   0x9   :  { %s755_s17 = smov 0  }
   0xa LB: > { %s431_s18 = sadd.s32 4294967295, %s717_s17   ;;  %s432_s19 = sadd.s32 4294967294, %s717_s17   ;;  %s717_s17 = sphi %s755_s17, %s21_s17   ;;  %s713_s16 = sphi %s753_s16, %s1019_s16   ;;  %s709_s15 = sphi %s751_s15, %s1018_s15   ;;  %s705_s14 = sphi %s749_s14, %s1017_s14   ;;  %s701_s13 = sphi %s747_s13, %s1016_s13   ;;  %s697_s12 = sphi %s745_s12, %s1015_s12   ;;  %s693_s11 = sphi %s743_s11, %s1014_s11   ;;  %s689_s10 = sphi %s741_s10, %s1013_s10   ;;  %s685_s9 = sphi %s739_s9, %s1012_s9  }
   0xb   : > { %s33_s20 = sadd.s32 1, %s713_s16  ;;  %p38_p0 = scmp.lt.s32.totalorder %s713_s16, 1 }
   0xc   : > { %p35_p1 = scmp.ge.s32.totalorder %s33_s20, 2  ;;  %s46_s21 = sadd.s32 1, %s705_s14 }
   0xd   : > { %s788_s22 = scalar_select %p38_p0, %s713_s16, 1 }
   0xe   : > { %s1021_s20 = smov (%p35_p1, %s33_s20), 0  ;;  %p53_p2 = scmp.ne.s32.totalorder %s705_s14, %s701_s13 }
   0xf   : > { %p54_p3 = scmp.eq.s32.totalorder %s717_s17, 0  ;;  %p41_p4 = scmp.lt.s32.totalorder %s1021_s20, 1 }
  0x10   : > { %p59_p5 = scmp.ne.s32.totalorder %s701_s13, %s697_s12  ;;  %p60_p7 = scmp.eq.s32.totalorder %s431_s18, 0 }
  0x11   : > { %p797_p6 = por %p54_p3, %p53_p2  ;;  %s101_s26 = ssub.s32 %s713_s16, %s1021_s20 }
  0x12   : > { %s42_s24 = scalar_select %p41_p4, %s1021_s20, 1 }
  0x13   : > { %p802_p8 = por %p60_p7, %p59_p5  ;;  %p102_p9 = scmp.eq.s32.totalorder %s101_s26, 0 }
  0x14   : > { %s43_s27 = ssub.s32 %s788_s22, %s42_s24  ;;  %s104_s28 = sadd.s32 1, %s693_s11 }
  0x15   : > { %s999_s25 = scalar_select %p802_p8, 1, 0 }
  0x16   : > { %p44_p10 = scmp.eq.s32.totalorder %s43_s27, 0  ;;  %p114_p11 = scmp.ne.s32.totalorder %s693_s11, %s689_s10 }
  0x17   : > { %s811_s29 = scalar_select %p102_p9, %s693_s11, %s104_s28  }
  0x18   : > { %s814_s30 = scalar_select %p44_p10, %s705_s14, %s46_s21  }
  0x19   : > { %p115_p12 = scmp.eq.s32.totalorder %s431_s18, 1  ;;  %p120_p13 = scmp.ne.s32.totalorder %s689_s10, %s685_s9 }
  0x1a   : > { %p121_p0 = scmp.eq.s32.totalorder %s432_s19, 1  ;;  %p471_p4 = scmp.lt.s32.totalorder %s717_s17, 2 }
  0x1b   : > { %p820_p1 = por %p115_p12, %p114_p11  ;;  %s831_s5 = sand.u32 1, %s705_s14  }
  0x1c   : > { %p825_p3 = por %p121_p0, %p120_p13  ;;  %s436_s6 = sshll.u32 %s788_s22, 7 }
  0x1d   : > { %s1000_s3 = scalar_select %p820_p1, 1, 0 }
  0x1e   : > { %s1001_s4 = scalar_select %p825_p3, 1, 0 }
  0x1f   : > { %s995_s7 = sshll.u32 %s831_s5, 3  ;;  %s840_s18 = scalar_lea.hbm %s992_s0, %s436_s6 }
  0x20   : > { %s145_s19 = scalar_lea.vmem [#allocation2], %s995_s7  ;;  %p846_p5 = pnand %p471_p4, %p797_p6 }
  0x21   : > { %s155_s21 = sshll.u32 %s145_s19, 4  ;;  %s142_s26 = scalar_lea.sflag [#allocation3], %s831_s5  ;;  %s850_s21 = int_to_ptr.vmem [resolvable:$true] %s155_s21 }
  0x22   : > { %s547_s27 = scalar_lea.hbm %s840_s18, 128  ;;  %p549_p11 = pneg %p846_p5 }
  0x23   : > { %p548_p10 = scmp.ne.s32.totalorder %s840_s18, %s547_s27  ;;  %s552_s8 = scalar_lea.hbm %s992_s0, 256 }
  0x24   : > { %p553_p6 = scmp.lt.u32.totalorder %s840_s18, %s992_s0  ;;  %p554_p0 = scmp.lt.u32.totalorder %s552_s8, %s547_s27 }
  0x25   : > { %p550_p12 = pnand %p549_p11, %p548_p10  ;;  %p556_p2 = scmp.lt.u32.totalorder %s547_s27, %s840_s18 }
  0x26   : > { %p555_p4 = por %p554_p0, %p553_p6 }
  0x27   : > { %p551_p13 = pneg %p550_p12 }
  0x28   : > { %p557_p7 = por %p556_p2, %p555_p4 }
  0x2a   : > { %p558_p9 = pnand %p557_p7, %p551_p13 }
  0x2c   : > { %561 = shalt.err (!%p558_p9)
}
  0x2d   : > { %s562_s7 = scalar_lea.vmem %s850_s21, 128  ;;  %s719_s23 = smov [#allocation2]  }
  0x2e   : > { %p563_p10 = scmp.ne.s32.totalorder %s850_s21, %s562_s7  ;;  %s567_s28 = sshll.u32 %s719_s23, 4  ;;  %s568_s28 = int_to_ptr.vmem [resolvable:$false] %s567_s28 }
  0x2f   : > { %s569_s12 = scalar_lea.vmem %s568_s28, 256  ;;  %p570_p1 = scmp.lt.s32.totalorder %s850_s21, %s568_s28 }
  0x30   : > { %p565_p12 = pnand %p563_p10, %p549_p11  ;;  %p571_p6 = scmp.lt.s32.totalorder %s569_s12, %s562_s7 }
  0x32   : > { %p566_p3 = pneg %p565_p12  ;;  %p572_p0 = por %p571_p6, %p570_p1 }
  0x34   : > { %p573_p2 = pnand %p572_p0, %p566_p3 }
  0x36   : > { %576 = shalt.err (!%p573_p2)
}
  0x37   : > { %463 = dma.hbm_to_vmem [thread:$0]  (!%p846_p5), %s840_s18, 128, %s850_s21, %s142_s26  }
  0x38   : > { %p1003_p7 = scmp.lt.s32.totalorder %s717_s17, 3  ;;  %p1004_p9 = scmp.ge.s32.totalorder %s717_s17, 1 }
  0x39   : > { %s893_s19 = scalar_lea.hbm %s993_s1, %s436_s6  ;;  %s1006_s23 = sshll.u32 %s831_s5, 3 }
  0x3a   : > { %p884_p13 = pnand %p1004_p9, %p1003_p7  ;;  %s166_s28 = scalar_lea.vmem [#allocation5], %s1006_s23 }
  0x3b   : > { %s176_s12 = sshll.u32 %s166_s28, 4  ;;  %s163_s18 = scalar_lea.sflag [#allocation6], %s831_s5  ;;  %s177_s12 = int_to_ptr.vmem [resolvable:$true] %s176_s12 }
  0x3c   : > { %s1005_s27 = scalar_select %p884_p13, 1, 0 }
  0x3d   : > { %s577_s21 = scalar_lea.hbm %s893_s19, 128  ;;  %s582_s6 = scalar_lea.hbm %s993_s1, 256 }
  0x3e   : > { %p578_p1 = scmp.ne.s32.totalorder %s893_s19, %s577_s21  ;;  %p583_p10 = scmp.lt.u32.totalorder %s893_s19, %s993_s1 }
  0x3f   : > { %p584_p12 = scmp.lt.u32.totalorder %s582_s6, %s577_s21  ;;  %p586_p0 = scmp.lt.u32.totalorder %s577_s21, %s893_s19 }
  0x40   : > { %p580_p3 = pnand %p578_p1, %p549_p11 }
  0x41   : > { %p585_p6 = por %p584_p12, %p583_p10 }
  0x42   : > { %p581_p4 = pneg %p580_p3 }
  0x43   : > { %p587_p2 = por %p586_p0, %p585_p6 }
  0x45   : > { %p588_p7 = pnand %p587_p2, %p581_p4 }
  0x47   : > { %591 = shalt.err (!%p588_p7)
}
  0x48   : > { %s592_s5 = scalar_lea.vmem %s177_s12, 128  ;;  %s720_s23 = smov [#allocation5]  }
  0x49   : > { %p593_p9 = scmp.ne.s32.totalorder %s177_s12, %s592_s5  ;;  %s597_s28 = sshll.u32 %s720_s23, 4  ;;  %s598_s28 = int_to_ptr.vmem [resolvable:$false] %s597_s28 }
  0x4a   : > { %s599_s22 = scalar_lea.vmem %s598_s28, 256  ;;  %p600_p8 = scmp.lt.s32.totalorder %s177_s12, %s598_s28 }
  0x4b   : > { %p595_p1 = pnand %p593_p9, %p549_p11  ;;  %p601_p13 = scmp.lt.s32.totalorder %s599_s22, %s592_s5 }
  0x4d   : > { %p596_p3 = pneg %p595_p1  ;;  %p602_p10 = por %p601_p13, %p600_p8 }
  0x4f   : > { %p603_p12 = pnand %p602_p10, %p596_p3 }
  0x51   : > { %606 = shalt.err (!%p603_p12)
}
  0x52   : > { %466 = dma.hbm_to_vmem [thread:$0]  (!%p846_p5), %s893_s19, 128, %s177_s12, %s163_s18  }
  0x53   : > { %p1007_p4 = scmp.ne.s32.totalorder %s1005_s27, 0 }
  0x54   : > { %s187_s21 = sand.u32 (!%p1007_p4), 1, %s701_s13   ;;  %p1008_p11 = scmp.ne.s32.totalorder (!%p1007_p4), %s999_s25, 0 }
  0x55   : > { %185 = sbr.rel (%p1007_p4) target bundleno = 330 (0x14a), region = 28  ;;  %s440_s26 = sshll.u32 (!%p1007_p4), %s187_s21, 3 }
  0x56   : > { %s188_s6 = scalar_lea.sflag (!%p1007_p4), [#allocation3], %s187_s21  ;;  %s191_s7 = scalar_lea.vmem (!%p1007_p4), [#allocation2], %s440_s26 }
  0x5c   : > { %672 = dma.done.wait (%p1008_p11), %s188_s6, 128  }
  0x5d   : > { %674 = vsyncadd (%p1008_p11), %s188_s6, 4294967168  ;;  %s197_s8 = scalar_lea.sflag [#allocation6], %s187_s21  ;;  %s200_s5 = scalar_lea.vmem [#allocation5], %s440_s26 }
  0x5e   : > { %676 = dma.done.wait (%p1008_p11), %s197_s8, 128  }
  0x5f   : > { %678 = vsyncadd (%p1008_p11), %s197_s8, 4294967168  ;;  %s223_s24 = sand.u32 1, %s689_s10   ;;  %vm236_vm0 = vcmask 64512   ;;  %v721_v0 = vmov 0.0   ;;  %vm722_vm1 = vmmov 0   ;;  %v238_v1 = vld [vmem:[%s191_s7] sm:$0xff] }
  0x60   : > { %449 = vmatprep.subr.mxu0 %v721_v0  ;;  %451 = vmatprep.mubr.msk.f32.mxu0 %vm722_vm1, %v721_v0  ;;  %s442_s27 = sshll.u32 %s223_s24, 3  ;;  %v239_v2 = vld [vmem:[%s200_s5] sm:$0xff]  ;;  %s444_s25 = sshll.u32 %s709_s15, 7 }
  0x61   : > { %s225_s19 = scalar_lea.vmem [#allocation7], %s442_s27  ;;  %v241_v3 = vsub.f32 %v238_v1, %v239_v2  ;;  %v240_v4 = vadd.f32 %v239_v2, %v238_v1  ;;  %s934_s28 = scalar_lea.hbm %s994_s2, %s444_s25 }
  0x62   : > { %237 = vst.msk [vmem:[%s225_s19] sm:$0xff] %vm236_vm0, %v721_v0  ;;  %s330_s12 = sshll.u32 %s225_s19, 4  ;;  %s317_s22 = scalar_lea.sflag [#allocation4], %s223_s24  ;;  %s936_s12 = int_to_ptr.vmem [resolvable:$true] %s330_s12 }
  0x63   : > { %450 = vmatpush3.xpose.msra.mxu0 %v241_v3  ;;  %s607_s21 = scalar_lea.vmem %s936_s12, 128  ;;  %p1009_p5 = scmp.ne.s32.totalorder %s1000_s3, 0 }
  0x64   : > { %p608_p8 = scmp.ne.s32.totalorder %s936_s12, %s607_s21  ;;  %s723_s15 = smov [#allocation7]  }
  0x65   : > { %s611_s26 = sshll.u32 %s723_s15, 4  ;;  %s612_s26 = int_to_ptr.vmem [resolvable:$false] %s611_s26 }
  0x66   : > { %452 = vmatmul.mubr.f32.vlgmr.msra.gmra.mrb[0].mxu0 %v240_v4  ;;  %p609_p13 = pnand %p608_p8, %p1009_p5  ;;  %s613_s6 = scalar_lea.vmem %s612_s26, 256 }
  0x67   : > { %p614_p0 = scmp.lt.s32.totalorder %s936_s12, %s612_s26  ;;  %p615_p2 = scmp.lt.s32.totalorder %s613_s6, %s607_s21 }
  0x68   : > { %p610_p6 = pneg %p609_p13 }
  0x69   : > { %v312_v5 = vld [vmem:[%s225_s19] sm:$0xff]  ;;  %p616_p7 = por %p615_p2, %p614_p0 }
  0x6b   : > { %p617_p9 = pnand %p616_p7, %p610_p6 }
 0x139   : > { %v308_v6 = vpop.f32.mrb[0].mxu0 }
 0x13a   : > { %v313_v7 = vadd.f32 %v312_v5, %v308_v6  ;;  %v453_v8 = vpop.f32.mrb[1].mxu0 }
 0x13c   : > { %315 = vst.msk [vmem:[%s225_s19] sm:$0xff] %vm236_vm0, %v313_v7 }
 0x13d   : > { %620 = shalt.err (!%p617_p9)
}
 0x13e   : > { %s621_s7 = scalar_lea.hbm %s934_s28, 128  ;;  %s625_s24 = scalar_lea.hbm %s994_s2, 256 }
 0x13f   : > { %p622_p1 = scmp.ne.s32.totalorder %s934_s28, %s621_s7  ;;  %p626_p12 = scmp.lt.u32.totalorder %s934_s28, %s994_s2 }
 0x140   : > { %p627_p4 = scmp.lt.u32.totalorder %s625_s24, %s621_s7  ;;  %p629_p8 = scmp.lt.u32.totalorder %s621_s7, %s934_s28 }
 0x141   : > { %p623_p3 = pnand %p622_p1, %p1009_p5 }
 0x142   : > { %p628_p11 = por %p627_p4, %p626_p12 }
 0x143   : > { %p624_p10 = pneg %p623_p3 }
 0x144   : > { %p630_p13 = por %p629_p8, %p628_p11 }
 0x146   : > { %p631_p6 = pnand %p630_p13, %p624_p10 }
 0x148   : > { %634 = shalt.err (!%p631_p6)
}
 0x149   : > { %458 = dma.vmem_to_hbm [thread:$0]  (%p1009_p5), %s936_s12, 128, %s934_s28, %s317_s22  }
 0x14a PF: > { %s342_s25 = sand.u32 1, %s685_s9   ;;  %p1010_p0 = scmp.ne.s32.totalorder %s1001_s4, 0 }
 0x14b   : > { %p1011_p2 = scmp.ge.s32.totalorder %s717_s17, 2  ;;  %s343_s18 = scalar_lea.sflag [#allocation4], %s342_s25 }
 0x14d   : > { %p468_p7 = pnand %p1011_p2, %p1010_p0 }
 0x14f   : > { %680 = dma.done.wait (!%p468_p7), %s343_s18, 128  }
 0x150   : > { %682 = vsyncadd (!%p468_p7), %s343_s18, 4294967168  ;;  %s21_s17 = sadd.s32 1, %s717_s17   ;;  %s1012_s9 = smov %s689_s10 }
 0x151   : > { %p18_p9 = scmp.ge.s32.totalorder %s21_s17, 4   ;;  %s1013_s10 = smov %s693_s11 }
 0x152   : > { %s1014_s11 = smov %s811_s29  ;;  %s1015_s12 = smov %s701_s13 }
 0x153   : > { %s1016_s13 = smov %s705_s14  ;;  %s1017_s14 = smov %s814_s30 }
 0x154   : > { %s1018_s15 = smov %s713_s16  ;;  %s1019_s16 = smov %s1021_s20 }
 0x155   :  { %20 = sbr.rel (!%p18_p9) target bundleno = 10 (0xa), region = 90 }
 0x15c   :  { %348 = vsyncpa [#allocation3], 1 }
 0x15d   :  { %350 = vsyncpa [#allocation3 + $0x1], 1 }
 0x15e   :  { %351 = vsyncpa [#allocation6], 1 }
 0x15f   :  { %353 = vsyncpa [#allocation6 + $0x1], 1 }
 0x160   :  { %354 = vsyncpa [#allocation4], 1 }
 0x161   :  { %356 = vsyncpa [#allocation4 + $0x1], 1 }

</bundles_post_ra>
